<compile_context>
chip_gen: v6e
topology: v6e:2x2x1
jax: 0.10.0
libtpu: 0.0.40
codegen_flags: <defaults>
</compile_context>

<pallas_src>
import jax
import jax.numpy as jnp
from jax.experimental import pallas as pl
from jax.experimental.pallas import tpu as pltpu

LEAKY_SLOPE = 0.2

# rows (= batch_tile * time_tile) per grid step; ~10-15 MiB live intermediates.
_MAX_ROWS_PER_TILE = 4096
_MAX_TIME_TILE = _MAX_ROWS_PER_TILE // 8


# ---------------------------------------------------------------------------
# Fused Pallas kernel: conv1 + conv2 + linear(+sigmoid) for one (batch, time)
# tile.  Grid axes: (batch tile [parallel], time chunk [arbitrary]).
# ---------------------------------------------------------------------------
def _fused_discriminator_kernel(x_ref, q1_ref, b1_ref, u0_ref, q2_ref, b2_ref,
                                wl_ref, bl_ref, out_ref, carry_ref):
    tb, tl, c5 = x_ref.shape
    m = tb * tl
    j = pl.program_id(1)

    # ---- conv1 (C_in -> 64, k=3, s=2, 'same') + LeakyReLU ------------------
    # One bf16 MXU dot: the x[4r-1] tap is pre-packed into the row host-side;
    # two consecutive conv1 outputs are packed per row -> 128-lane dense.
    x = x_ref[...].reshape(m, c5)                                   # bf16
    g = jnp.dot(x, q1_ref[...], preferred_element_type=jnp.float32)
    g = g + b1_ref[...]
    g = jnp.maximum(g, LEAKY_SLOPE * g)                             # (m,128) f32

    # ---- conv2 (64 -> 128, k=3, s=2, 'same') + LeakyReLU -------------------
    # Row r holds [h1[2r] | h1[2r+1]]; output row r also needs h1[2r-1], i.e.
    # the previous row's upper half: XLU roll + chunk-boundary carry scratch.
    g_hi = g[:, 64:]                                                # (m,64)
    g_prev = pltpu.roll(g_hi, shift=1, axis=0)                      # row r <- r-1

    @pl.when(j == 0)
    def _init_carry():                                              # conv zero pad
        carry_ref[...] = jnp.zeros_like(carry_ref)

    # Rows at r_local == 0 take the carried boundary row (zero at chunk 0);
    # this also kills the wrapped / cross-batch-element rows from the roll.
    r_idx = jax.lax.broadcasted_iota(jnp.int32, (1, tl, 1), 1)
    is_first = r_idx == 0
    g_prev3 = g_prev.reshape(tb, tl, 64)
    g_prev3 = jnp.where(is_first, carry_ref[...][:, None, :], g_prev3)
    g_prev = g_prev3.reshape(m, 64)
    carry_ref[...] = g_hi.reshape(tb, tl, 64)[:, tl - 1, :]         # next chunk

    g16 = g.astype(jnp.bfloat16)
    h = jnp.dot(g_prev.astype(jnp.bfloat16), u0_ref[...],
                preferred_element_type=jnp.float32)
    h = h + jnp.dot(g16, q2_ref[...], preferred_element_type=jnp.float32)
    h = h + b2_ref[...]
    h = jnp.maximum(h, LEAKY_SLOPE * h)                             # (m,128) f32

    # ---- Flatten + Linear(F, 1): VPU multiply, reduce time first, lanes last
    prod = h.reshape(tb, tl, 128) * wl_ref[...][None, :, :]
    part = jnp.sum(jnp.sum(prod, axis=1), axis=1, keepdims=True)    # (tb, 1)

    @pl.when(j == 0)
    def _init_out():
        out_ref[...] = jnp.zeros_like(out_ref)
    out_ref[...] += part

    @pl.when(j == pl.num_programs(1) - 1)
    def _finalize():
        out_ref[...] = jax.nn.sigmoid(out_ref[...] + bl_ref[...])


# ---------------------------------------------------------------------------
# Host-side weight / input repacking (layout plumbing only, done once).
# ---------------------------------------------------------------------------
def _pack_weights(params, l4):
    w1, b1 = params["w1"], params["b1"]              # (64, C, 3), (64,)
    w2, b2 = params["w2"], params["b2"]              # (128, 64, 3), (128,)
    w_lin, b_lin = params["w_lin"], params["b_lin"]  # (1, 128*l4), (1,)

    c = w1.shape[1]
    v0, v1, v2 = (w1[:, :, k].T for k in range(3))   # each (C, 64)
    z = jnp.zeros((c, 64), w1.dtype)
    # Input row lanes: [x[4r-1] | x[4r] | x[4r+1] | x[4r+2] | x[4r+3]] (C each)
    # Output lanes:    [h1[2r] (64 ch) | h1[2r+1] (64 ch)]
    q1 = jnp.concatenate([
        jnp.concatenate([v0, z], axis=1),            # x[4r-1] -> h1[2r]  tap 0
        jnp.concatenate([v1, z], axis=1),            # x[4r]   -> h1[2r]  tap 1
        jnp.concatenate([v2, v0], axis=1),           # x[4r+1] -> taps 2 / 0
        jnp.concatenate([z, v1], axis=1),            # x[4r+2] -> h1[2r+1] tap 1
        jnp.concatenate([z, v2], axis=1),            # x[4r+3] -> h1[2r+1] tap 2
    ], axis=0).astype(jnp.bfloat16)                  # (5C, 128)
    b1_2 = jnp.concatenate([b1, b1]).reshape(1, 128)

    u0, u1, u2 = (w2[:, :, k].T for k in range(3))   # each (64, 128)
    u0_b = u0.astype(jnp.bfloat16)                   # shifted (h1[2t-1]) path only
    q2 = jnp.concatenate([u1, u2], axis=0).astype(jnp.bfloat16)     # (128, 128)
    b2r = b2.reshape(1, 128)

    # PyTorch Flatten of (B, 128, L4) is channel-major: flat[ch*L4 + t].
    wl = w_lin.reshape(128, l4).T                    # (L4, 128), f32
    blr = b_lin.reshape(1, 1)
    return q1, b1_2, u0_b, q2, b2r, wl, blr


def _pack_input(x, l4, b_pad):
    b, c, l = x.shape
    x_nlc = jnp.transpose(x, (0, 2, 1))              # single NCL -> NLC relayout
    if b_pad != b:
        x_nlc = jnp.concatenate(
            [x_nlc, jnp.zeros((b_pad - b, l, c), x_nlc.dtype)], axis=0)
    main = x_nlc.reshape(b_pad, l4, 4 * c)           # 4 time steps per row
    last = x_nlc[:, 3::4, :]                         # x[4r+3]
    prev = jnp.concatenate(
        [jnp.zeros((b_pad, 1, c), x_nlc.dtype), last[:, :-1, :]], axis=1)
    xr = jnp.concatenate([prev, main], axis=-1)      # (b_pad, l4, 5C)
    return xr.astype(jnp.bfloat16)                   # bf16 halves HBM traffic


def _choose_tiling(b, l4):
    """Returns (padded_batch, batch_tile, time_tile)."""
    # Time tile: full L//4 when small, otherwise a multiple-of-16 divisor so
    # long spectrograms pipeline over the 'arbitrary' grid axis (v7x VMEM).
    if l4 <= _MAX_TIME_TILE:
        tl = l4
    else:
        tl = l4  # TODO(synk): pad+mask the time axis when no divisor exists.
        for cand in range((_MAX_TIME_TILE // 16) * 16, 15, -16):
            if l4 % cand == 0:
                tl = cand
                break
    # Batch tile: keep (tb, 1) output blocks layout-legal (tb % 8 == 0 or the
    # whole batch) and aim for >= 2 batch tiles so megacore has work.
    if b < 16 and b * tl <= _MAX_ROWS_PER_TILE:
        return b, b, tl                              # tiny batch: one full tile
    max_tb = max(8, ((_MAX_ROWS_PER_TILE // tl) // 8) * 8)
    half_b = max(8, 8 * ((b // 2 + 7) // 8))
    tb = min(max_tb, half_b)
    b_pad = ((b + tb - 1) // tb) * tb
    return b_pad, tb, tl


# ---------------------------------------------------------------------------
# DiscriminatorF forward
# ---------------------------------------------------------------------------
def discriminator_f_forward(x, params):
    b, c, l = x.shape
    if l % 4 != 0:
        raise ValueError("spectrogram_length must be divisible by 4")
    l4 = l // 4
    c5 = 5 * c

    b_pad, tb, tl = _choose_tiling(b, l4)
    nt = l4 // tl
    xr = _pack_input(x, l4, b_pad)
    q1, b1_2, u0, q2, b2r, wl, blr = _pack_weights(params, l4)

    grid = (b_pad // tb, nt)
    const2 = lambda i, j: (0, 0)

    out = pl.pallas_call(
        _fused_discriminator_kernel,
        out_shape=jax.ShapeDtypeStruct((b_pad, 1), jnp.float32),
        grid=grid,
        in_specs=[
            pl.BlockSpec((tb, tl, c5), lambda i, j: (i, j, 0)),  # x (bf16)
            pl.BlockSpec((c5, 128), const2),                     # Q1 (bf16)
            pl.BlockSpec((1, 128), const2),                      # b1 (duplicated)
            pl.BlockSpec((64, 128), const2),                     # U0 (bf16)
            pl.BlockSpec((128, 128), const2),                    # Q2 (bf16)
            pl.BlockSpec((1, 128), const2),                      # b2
            pl.BlockSpec((tl, 128), lambda i, j: (j, 0)),        # linear w (time-tiled)
            pl.BlockSpec((1, 1), const2),                        # linear bias
        ],
        out_specs=pl.BlockSpec((tb, 1), lambda i, j: (i, 0)),
        scratch_shapes=[pltpu.VMEM((tb, 64), jnp.float32)],      # conv2 carry row
        compiler_params=pltpu.CompilerParams(
            dimension_semantics=("parallel", "arbitrary"),
            vmem_limit_bytes=48 * 1024 * 1024),
    )(xr, q1, b1_2, u0, q2, b2r, wl, blr)
    return out[:b]


def init_params(key, input_channels, spectrogram_length):
    k1, k2, k3, k4, k5, k6 = jax.random.split(key, 6)
    feat = 128 * (spectrogram_length // 4)
    s = 0.1
    return {
        "w1": s * jax.random.normal(k1, (64, input_channels, 3), jnp.float32),
        "b1": s * jax.random.normal(k2, (64,), jnp.float32),
        "w2": s * jax.random.normal(k3, (128, 64, 3), jnp.float32),
        "b2": s * jax.random.normal(k4, (128,), jnp.float32),
        "w_lin": s * jax.random.normal(k5, (1, feat), jnp.float32),
        "b_lin": s * jax.random.normal(k6, (1,), jnp.float32),
    }


# ---------------------------------------------------------------------------
# Pure-JAX f32 reference (sanity check of the Pallas path)
# ---------------------------------------------------------------------------
def _reference_forward(x, params):
    def conv(x, w, b):
        y = jax.lax.conv_general_dilated(
            x, w, window_strides=(2,), padding=[(1, 1)],
            dimension_numbers=("NCH", "OIH", "NCH"))
        y = y + b[None, :, None]
        return jnp.where(y >= 0.0, y, LEAKY_SLOPE * y)

    h = conv(x, params["w1"], params["b1"])
    h = conv(h, params["w2"], params["b2"])
    flat = h.reshape(h.shape[0], -1)
    z = flat @ params["w_lin"].T + params["b_lin"][None, :]
    return jax.nn.sigmoid(z)


if __name__ == "__main__":
    B, C_IN, L = 2, 4, 16            # batch, input_channels, spectrogram_length
    key = jax.random.PRNGKey(0)
    kx, kp = jax.random.split(key)
    x = jax.random.normal(kx, (B, C_IN, L), jnp.float32)
    params = init_params(kp, C_IN, L)

    fwd = jax.jit(discriminator_f_forward)
    out = jax.block_until_ready(fwd(x, params))

    ref = _reference_forward(x, params)
    assert out.shape == (B, 1), out.shape
    # bf16 MXU operands with f32 accumulation -> relaxed tolerance vs f32 ref.
    assert jnp.allclose(out, ref, atol=1e-2, rtol=1e-2), (out, ref)

    print("KERNEL_OK")
</pallas_src>

<mosaic_0001>
module attributes {stable_mosaic.version = 11 : i64} {
  func.func @_fused_discriminator_kernel(%arg0: i32, %arg1: i32, %arg2: memref<2x4x20xbf16, #tpu.memory_space<vmem>>, %arg3: memref<20x128xbf16, #tpu.memory_space<vmem>>, %arg4: memref<1x128xf32, #tpu.memory_space<vmem>>, %arg5: memref<64x128xbf16, #tpu.memory_space<vmem>>, %arg6: memref<128x128xbf16, #tpu.memory_space<vmem>>, %arg7: memref<1x128xf32, #tpu.memory_space<vmem>>, %arg8: memref<4x128xf32, #tpu.memory_space<vmem>>, %arg9: memref<1x1xf32, #tpu.memory_space<vmem>>, %arg10: memref<2x1xf32, #tpu.memory_space<vmem>>, %arg11: memref<2x64xf32, #tpu.memory_space<vmem>>) attributes {dimension_semantics = [#tpu.dimension_semantics<parallel>, #tpu.dimension_semantics<arbitrary>], iteration_bounds = array<i64: 1, 1>, scalar_prefetch = 0 : i64, scratch_operands = 1 : i64, tpu.core_type = #tpu.core_type<tc>, window_params = [{transform_indices = @transform_0, window_bounds = array<i64: 2, 4, 20>}, {pipeline_mode = #tpu.pipeline_mode<synchronous>, transform_indices = @transform_1, window_bounds = array<i64: 20, 128>}, {pipeline_mode = #tpu.pipeline_mode<synchronous>, transform_indices = @transform_2, window_bounds = array<i64: 1, 128>}, {pipeline_mode = #tpu.pipeline_mode<synchronous>, transform_indices = @transform_3, window_bounds = array<i64: 64, 128>}, {pipeline_mode = #tpu.pipeline_mode<synchronous>, transform_indices = @transform_4, window_bounds = array<i64: 128, 128>}, {pipeline_mode = #tpu.pipeline_mode<synchronous>, transform_indices = @transform_5, window_bounds = array<i64: 1, 128>}, {transform_indices = @transform_6, window_bounds = array<i64: 4, 128>}, {pipeline_mode = #tpu.pipeline_mode<synchronous>, transform_indices = @transform_7, window_bounds = array<i64: 1, 1>}, {transform_indices = @transform_8, window_bounds = array<i64: 2, 1>}]} {
    %c0 = arith.constant 0 : index
    %c0_0 = arith.constant 0 : index
    %c0_1 = arith.constant 0 : index
    %0 = vector.load %arg2[%c0, %c0_0, %c0_1] : memref<2x4x20xbf16, #tpu.memory_space<vmem>>, vector<2x4x20xbf16>
    %1 = vector.shape_cast %0 : vector<2x4x20xbf16> to vector<8x20xbf16>
    %c0_2 = arith.constant 0 : index
    %c0_3 = arith.constant 0 : index
    %2 = vector.load %arg3[%c0_2, %c0_3] : memref<20x128xbf16, #tpu.memory_space<vmem>>, vector<20x128xbf16>
    %cst = arith.constant dense<0.000000e+00> : vector<8x128xf32>
    %3 = tpu.matmul %1, %2, %cst {dimension_numbers = #tpu.dot_dimension_numbers<[1], [0], [0], [1], [0, 0, 1, 1], [], []>} : vector<8x20xbf16>, vector<20x128xbf16>, vector<8x128xf32> -> vector<8x128xf32>
    %c0_4 = arith.constant 0 : index
    %c0_5 = arith.constant 0 : index
    %4 = vector.load %arg4[%c0_4, %c0_5] : memref<1x128xf32, #tpu.memory_space<vmem>>, vector<1x128xf32>
    %5 = vector.broadcast %4 : vector<1x128xf32> to vector<8x128xf32>
    %6 = arith.addf %3, %5 : vector<8x128xf32>
    %cst_6 = arith.constant 2.000000e-01 : f32
    %7 = vector.broadcast %cst_6 : f32 to vector<8x128xf32>
    %8 = arith.mulf %7, %6 : vector<8x128xf32>
    %9 = arith.maximumf %6, %8 : vector<8x128xf32>
    %10 = vector.extract_strided_slice %9 {offsets = [0, 64], sizes = [8, 64], strides = [1, 1]} : vector<8x128xf32> to vector<8x64xf32>
    %c1_i32 = arith.constant 1 : i32
    %11 = tpu.dynamic_rotate %10 by %c1_i32 dim 0 : vector<8x64xf32>, i32 -> vector<8x64xf32>
    %c0_i32 = arith.constant 0 : i32
    %12 = arith.cmpi eq, %arg1, %c0_i32 : i32
    %13 = arith.extui %12 : i1 to i32
    %c0_i32_7 = arith.constant 0 : i32
    %14 = arith.cmpi ne, %13, %c0_i32_7 : i32
    scf.if %14 {
      %cst_34 = arith.constant 0.000000e+00 : f32
      %61 = vector.broadcast %cst_34 : f32 to vector<2x64xf32>
      %c0_35 = arith.constant 0 : index
      %c0_36 = arith.constant 0 : index
      %62 = vector.load %arg11[%c0_35, %c0_36] : memref<2x64xf32, #tpu.memory_space<vmem>>, vector<2x64xf32>
      tpu.vector_store %arg11[%c0_35, %c0_36], %61 {strides = array<i32>} : memref<2x64xf32, #tpu.memory_space<vmem>>, vector<2x64xf32>,
    } else {
    }
    %15 = tpu.iota {dimensions = array<i32: 1>} : vector<1x4x1xi32>
    %c0_i32_8 = arith.constant 0 : i32
    %16 = vector.broadcast %c0_i32_8 : i32 to vector<1x4x1xi32>
    %17 = arith.cmpi eq, %15, %16 : vector<1x4x1xi32>
    %18 = vector.shape_cast %11 : vector<8x64xf32> to vector<2x4x64xf32>
    %c0_9 = arith.constant 0 : index
    %c0_10 = arith.constant 0 : index
    %19 = vector.load %arg11[%c0_9, %c0_10] : memref<2x64xf32, #tpu.memory_space<vmem>>, vector<2x64xf32>
    %20 = vector.shape_cast %19 : vector<2x64xf32> to vector<2x1x64xf32>
    %21 = vector.shape_cast %17 : vector<1x4x1xi1> to vector<1x4x1xi1>
    %22 = vector.broadcast %21 : vector<1x4x1xi1> to vector<2x4x64xi1>
    %23 = vector.shape_cast %20 : vector<2x1x64xf32> to vector<2x1x64xf32>
    %24 = vector.broadcast %23 : vector<2x1x64xf32> to vector<2x4x64xf32>
    %25 = arith.select %22, %24, %18 : vector<2x4x64xi1>, vector<2x4x64xf32>
    %26 = vector.shape_cast %25 : vector<2x4x64xf32> to vector<8x64xf32>
    %27 = vector.shape_cast %10 : vector<8x64xf32> to vector<2x4x64xf32>
    %28 = vector.extract_strided_slice %27 {offsets = [0, 3, 0], sizes = [2, 1, 64], strides = [1, 1, 1]} : vector<2x4x64xf32> to vector<2x1x64xf32>
    %29 = vector.shape_cast %28 : vector<2x1x64xf32> to vector<2x64xf32>
    %c0_11 = arith.constant 0 : index
    %c0_12 = arith.constant 0 : index
    %30 = vector.load %arg11[%c0_11, %c0_12] : memref<2x64xf32, #tpu.memory_space<vmem>>, vector<2x64xf32>
    tpu.vector_store %arg11[%c0_11, %c0_12], %29 {strides = array<i32>} : memref<2x64xf32, #tpu.memory_space<vmem>>, vector<2x64xf32>,
    %31 = arith.truncf %9 : vector<8x128xf32> to vector<8x128xbf16>
    %32 = arith.truncf %26 : vector<8x64xf32> to vector<8x64xbf16>
    %c0_13 = arith.constant 0 : index
    %c0_14 = arith.constant 0 : index
    %33 = vector.load %arg5[%c0_13, %c0_14] : memref<64x128xbf16, #tpu.memory_space<vmem>>, vector<64x128xbf16>
    %cst_15 = arith.constant dense<0.000000e+00> : vector<8x128xf32>
    %34 = tpu.matmul %32, %33, %cst_15 {dimension_numbers = #tpu.dot_dimension_numbers<[1], [0], [0], [1], [0, 0, 1, 1], [], []>} : vector<8x64xbf16>, vector<64x128xbf16>, vector<8x128xf32> -> vector<8x128xf32>
    %c0_16 = arith.constant 0 : index
    %c0_17 = arith.constant 0 : index
    %35 = vector.load %arg6[%c0_16, %c0_17] : memref<128x128xbf16, #tpu.memory_space<vmem>>, vector<128x128xbf16>
    %cst_18 = arith.constant dense<0.000000e+00> : vector<8x128xf32>
    %36 = tpu.matmul %31, %35, %cst_18 {dimension_numbers = #tpu.dot_dimension_numbers<[1], [0], [0], [1], [0, 0, 1, 1], [], []>} : vector<8x128xbf16>, vector<128x128xbf16>, vector<8x128xf32> -> vector<8x128xf32>
    %37 = arith.addf %34, %36 : vector<8x128xf32>
    %c0_19 = arith.constant 0 : index
    %c0_20 = arith.constant 0 : index
    %38 = vector.load %arg7[%c0_19, %c0_20] : memref<1x128xf32, #tpu.memory_space<vmem>>, vector<1x128xf32>
    %39 = vector.broadcast %38 : vector<1x128xf32> to vector<8x128xf32>
    %40 = arith.addf %37, %39 : vector<8x128xf32>
    %cst_21 = arith.constant 2.000000e-01 : f32
    %41 = vector.broadcast %cst_21 : f32 to vector<8x128xf32>
    %42 = arith.mulf %41, %40 : vector<8x128xf32>
    %43 = arith.maximumf %40, %42 : vector<8x128xf32>
    %44 = vector.shape_cast %43 : vector<8x128xf32> to vector<2x4x128xf32>
    %c0_22 = arith.constant 0 : index
    %c0_23 = arith.constant 0 : index
    %45 = vector.load %arg8[%c0_22, %c0_23] : memref<4x128xf32, #tpu.memory_space<vmem>>, vector<4x128xf32>
    %46 = vector.shape_cast %45 : vector<4x128xf32> to vector<1x4x128xf32>
    %47 = vector.broadcast %46 : vector<1x4x128xf32> to vector<2x4x128xf32>
    %48 = arith.mulf %44, %47 : vector<2x4x128xf32>
    %cst_24 = arith.constant dense<0.000000e+00> : vector<2x128xf32>
    %49 = vector.multi_reduction <add>, %48, %cst_24 [1] : vector<2x4x128xf32> to vector<2x128xf32>
    %cst_25 = arith.constant dense<0.000000e+00> : vector<2xf32>
    %50 = vector.multi_reduction <add>, %49, %cst_25 [1] : vector<2x128xf32> to vector<2xf32>
    %51 = vector.shape_cast %50 : vector<2xf32> to vector<2x1xf32>
    %c0_i32_26 = arith.constant 0 : i32
    %52 = arith.cmpi eq, %arg1, %c0_i32_26 : i32
    %53 = arith.extui %52 : i1 to i32
    %c0_i32_27 = arith.constant 0 : i32
    %54 = arith.cmpi ne, %53, %c0_i32_27 : i32
    scf.if %54 {
      %cst_34 = arith.constant 0.000000e+00 : f32
      %61 = vector.broadcast %cst_34 : f32 to vector<2x1xf32>
      %c0_35 = arith.constant 0 : index
      %c0_36 = arith.constant 0 : index
      %62 = vector.load %arg10[%c0_35, %c0_36] : memref<2x1xf32, #tpu.memory_space<vmem>>, vector<2x1xf32>
      tpu.vector_store %arg10[%c0_35, %c0_36], %61 {strides = array<i32>} : memref<2x1xf32, #tpu.memory_space<vmem>>, vector<2x1xf32>,
    } else {
    }
    %c0_28 = arith.constant 0 : index
    %c0_29 = arith.constant 0 : index
    %55 = vector.load %arg10[%c0_28, %c0_29] : memref<2x1xf32, #tpu.memory_space<vmem>>, vector<2x1xf32>
    %56 = arith.addf %55, %51 : vector<2x1xf32>
    %c0_30 = arith.constant 0 : index
    %c0_31 = arith.constant 0 : index
    %57 = vector.load %arg10[%c0_30, %c0_31] : memref<2x1xf32, #tpu.memory_space<vmem>>, vector<2x1xf32>
    tpu.vector_store %arg10[%c0_30, %c0_31], %56 {strides = array<i32>} : memref<2x1xf32, #tpu.memory_space<vmem>>, vector<2x1xf32>,
    %c0_i32_32 = arith.constant 0 : i32
    %58 = arith.cmpi eq, %arg1, %c0_i32_32 : i32
    %59 = arith.extui %58 : i1 to i32
    %c0_i32_33 = arith.constant 0 : i32
    %60 = arith.cmpi ne, %59, %c0_i32_33 : i32
    scf.if %60 {
      %c0_34 = arith.constant 0 : index
      %c0_35 = arith.constant 0 : index
      %61 = vector.load %arg10[%c0_34, %c0_35] : memref<2x1xf32, #tpu.memory_space<vmem>>, vector<2x1xf32>
      %c0_36 = arith.constant 0 : index
      %c0_37 = arith.constant 0 : index
      %62 = vector.load %arg9[%c0_36, %c0_37] : memref<1x1xf32, #tpu.memory_space<vmem>>, vector<1x1xf32>
      %63 = vector.broadcast %62 : vector<1x1xf32> to vector<2x1xf32>
      %64 = arith.addf %61, %63 : vector<2x1xf32>
      %65 = arith.negf %64 : vector<2x1xf32>
      %66 = math.exp %65 : vector<2x1xf32>
      %cst_38 = arith.constant 1.000000e+00 : f32
      %67 = vector.broadcast %cst_38 : f32 to vector<2x1xf32>
      %68 = arith.addf %67, %66 : vector<2x1xf32>
      %69 = arith.divf %67, %68 : vector<2x1xf32>
      %c0_39 = arith.constant 0 : index
      %c0_40 = arith.constant 0 : index
      %70 = vector.load %arg10[%c0_39, %c0_40] : memref<2x1xf32, #tpu.memory_space<vmem>>, vector<2x1xf32>
      tpu.vector_store %arg10[%c0_39, %c0_40], %69 {strides = array<i32>} : memref<2x1xf32, #tpu.memory_space<vmem>>, vector<2x1xf32>,
    } else {
    }
    return
  }
  func.func @transform_0(%arg0: i32, %arg1: i32) -> (i32, i32, i32) {
    %c0_i32 = arith.constant 0 : i32
    %c0_i32_0 = arith.constant 0 : i32
    return %arg0, %arg1, %c0_i32 : i32, i32, i32
  }
  func.func @transform_1(%arg0: i32, %arg1: i32) -> (i32, i32) {
    %c0_i32 = arith.constant 0 : i32
    %c0_i32_0 = arith.constant 0 : i32
    %c0_i32_1 = arith.constant 0 : i32
    return %c0_i32, %c0_i32_0 : i32, i32
  }
  func.func @transform_2(%arg0: i32, %arg1: i32) -> (i32, i32) {
    %c0_i32 = arith.constant 0 : i32
    %c0_i32_0 = arith.constant 0 : i32
    %c0_i32_1 = arith.constant 0 : i32
    return %c0_i32, %c0_i32_0 : i32, i32
  }
  func.func @transform_3(%arg0: i32, %arg1: i32) -> (i32, i32) {
    %c0_i32 = arith.constant 0 : i32
    %c0_i32_0 = arith.constant 0 : i32
    %c0_i32_1 = arith.constant 0 : i32
    return %c0_i32, %c0_i32_0 : i32, i32
  }
  func.func @transform_4(%arg0: i32, %arg1: i32) -> (i32, i32) {
    %c0_i32 = arith.constant 0 : i32
    %c0_i32_0 = arith.constant 0 : i32
    %c0_i32_1 = arith.constant 0 : i32
    return %c0_i32, %c0_i32_0 : i32, i32
  }
  func.func @transform_5(%arg0: i32, %arg1: i32) -> (i32, i32) {
    %c0_i32 = arith.constant 0 : i32
    %c0_i32_0 = arith.constant 0 : i32
    %c0_i32_1 = arith.constant 0 : i32
    return %c0_i32, %c0_i32_0 : i32, i32
  }
  func.func @transform_6(%arg0: i32, %arg1: i32) -> (i32, i32) {
    %c0_i32 = arith.constant 0 : i32
    %c0_i32_0 = arith.constant 0 : i32
    return %arg1, %c0_i32 : i32, i32
  }
  func.func @transform_7(%arg0: i32, %arg1: i32) -> (i32, i32) {
    %c0_i32 = arith.constant 0 : i32
    %c0_i32_0 = arith.constant 0 : i32
    %c0_i32_1 = arith.constant 0 : i32
    return %c0_i32, %c0_i32_0 : i32, i32
  }
  func.func @transform_8(%arg0: i32, %arg1: i32) -> (i32, i32) {
    %c0_i32 = arith.constant 0 : i32
    %c0_i32_0 = arith.constant 0 : i32
    return %arg0, %c0_i32 : i32, i32
  }
}

</mosaic_0001>

<bundles_post_ra>
// kernel: discriminator_f_forward.1
= control target key start
LH: loop header
LB: loop body
LE: loop exit
PB: predicated region body
PF: predicated region fallthrough
CT: control target
= control target key end

     0   :  { %vm67_vm0 = vcmask 1041408   ;;  %v542_v0 = vmov 0.0   ;;  %vm543_vm1 = vmmov 0   ;;  %v544_v2 = vmov 1983009808   ;;  %s545_s14 = smov 64   ;;  %s701_s1 = inlined_call_operand.vmem [shape: bf16[20,128], index: 1, kind: input, shape index: {}]   ;;  %s702_s0 = inlined_call_operand.vmem [shape: bf16[2,4,20], index: 0, kind: input, shape index: {}]   ;;  %s703_s4 = inlined_call_operand.vmem [shape: bf16[128,128], index: 4, kind: input, shape index: {}]   ;;  %s704_s3 = inlined_call_operand.vmem [shape: bf16[64,128], index: 3, kind: input, shape index: {}]   ;;  %s705_s2 = inlined_call_operand.vmem [shape: f32[1,128], index: 2, kind: input, shape index: {}]   ;;  %s706_s7 = inlined_call_operand.<no memory space> [shape: f32[1,1], index: 7, kind: input, shape index: {}]   ;;  %s707_s8 = inlined_call_operand.vmem [shape: f32[2,1], index: 8, kind: output, shape index: {}]   ;;  %s708_s5 = inlined_call_operand.vmem [shape: f32[1,128], index: 5, kind: input, shape index: {}]   ;;  %s709_s6 = inlined_call_operand.vmem [shape: f32[4,128], index: 6, kind: input, shape index: {}]  }
   0x1   :  { %479 = vmatprep.subr.bf16.mxu0 %v542_v0  ;;  %v524_v1 = vld [vmem:[%s701_s1 + $0x8] ss:$0 sps:$4 sm:$0x33]   ;;  %483 = vmatprep.mubr.msk.bf16.mxu0 %vm543_vm1, %v542_v0  ;;  %v48_v3 = vunpack.c.l.s4 %v544_v2  ;;  %v50_v4 = vlaneseq  ;;  %v32_v5 = vld [vmem:[%s702_s0] sm:$0x3]  ;;  %v526_v11 = vld [vmem:[%s703_s4 + $0x38] sm:$0xff]   ;;  %v13_v63 = vstv %s706_s7 }
   0x2   :  { %487 = vmatprep.subr.bf16.mxu1 %v542_v0  ;;  %503 = vmatprep.mubr.msk.bf16.mxu1 %vm543_vm1, %v542_v0  ;;  %v69_v6 = vsel %vm67_vm0, %v524_v1, 0  ;;  %v525_v7 = vld [vmem:[%s701_s1] sm:$0xff]   ;;  %v527_v14 = vld [vmem:[%s703_s4 + $0x30] sm:$0xff]   ;;  %vm63_vm2 = vcmask 162816   ;;  %v528_v16 = vld [vmem:[%s703_s4 + $0x28] sm:$0xff]   ;;  %vm122_vm3 = vcmask 517120  }
   0x3   :  { %v33_v8 = vld [vmem:[%s702_s0 + $0x2] sm:$0x3]  ;;  %v49_v9 = vunpack.c.0.s8 %v48_v3  ;;  %v611_v10 = vshrl.u32 %v50_v4, 7  ;;  %480 = vmatpush3.bf16.msra.mxu0 %v69_v6  ;;  %488 = vmatpush3.bf16.msra.mxu1 %v526_v11  ;;  %v530_v18 = vld [vmem:[%s703_s4 + $0x18] sm:$0xff]   ;;  %v531_v19 = vld [vmem:[%s703_s4 + $0x10] sm:$0xff]   ;;  %vm177_vm4 = vcmask 1044484  }
   0x4   :  { %v46_v12 = vcombine.low %v32_v5, %v33_v8  ;;  %481 = vmatprep.subr.bf16.mxu0 %v542_v0  ;;  %489 = vmatprep.subr.bf16.mxu1 %v542_v0  ;;  %v529_v17 = vld [vmem:[%s703_s4 + $0x20] sm:$0xff]   ;;  %v532_v20 = vld [vmem:[%s703_s4 + $0x8] sm:$0xff]   ;;  %v534_v22 = vld [vmem:[%s704_s3 + $0x18] sm:$0xff]   ;;  %123 = vst.msk [vmem:[#allocation2] sm:$0x3] %vm122_vm3, %v542_v0  ;;  %vm182_vm6 = vcmask 520195  }
   0x5   :  { %v52_v13 = vsub.s32 %v49_v9, %v611_v10  ;;  %v533_v21 = vld [vmem:[%s703_s4] sm:$0xff]   ;;  %v535_v23 = vld [vmem:[%s704_s3 + $0x10] sm:$0xff]   ;;  %v536_v24 = vld [vmem:[%s704_s3 + $0x8] sm:$0xff]   ;;  %v171_v33 = vsub.s32 3, %v611_v10  ;;  %v546_v40 = vmov 1966171168  }
   0x6   :  { %v441_v25 = vld [vmem:[%s705_s2] ss:$0 sm:$0xff]  ;;  %v141_v41 = vunpack.c.l.s4 %v546_v40  ;;  %v158_v48 = vsub.s32 0, %v611_v10  ;;  %vm126_vm5 = vcmp.eq.s32.totalorder %v611_v10, 0  ;;  %vm326_vm7 = vcmask 523264  }
   0x7   :  { %v53_v15 = vrot.slane %v46_v12, %v52_v13  ;;  %482 = vmatpush3.bf16.msra.mxu0 %v525_v7  ;;  %490 = vmatpush3.bf16.msra.mxu1 %v527_v14  ;;  %v537_v26 = vld [vmem:[%s704_s3] sm:$0xff]   ;;  %vm412_vm8 = vcmask 1024   ;;  %14 = vst [vmem:[#allocation3] sm:$0x1] %v13_v63  ;;  %vm386_vm9 = vcmask 1043456   ;;  %vm403_vm10 = vcmask 1041409  }
   0x8   :  { %507 = vmatprep.subr.bf16.mxu0 %v542_v0  ;;  %491 = vmatprep.subr.bf16.mxu1 %v542_v0  ;;  %v142_v42 = vunpack.c.0.s8 %v141_v41  ;;  %413 = vst.msk [vmem:[%s707_s8] sm:$0x3] %vm412_vm8, %v542_v0  ;;  %v459_v2 = vld [vmem:[%s708_s5] ss:$0 sm:$0xff] }
   0x9   :  { %v383_v8 = vld [vmem:[%s709_s6] sm:$0xf] }
   0xa   :  { %484 = vmatmul.mubr.msk.bf16.vlgmr.msra.gmra.mxu0 %vm63_vm2, %v53_v15  ;;  %v145_v45 = vsub.s32 %v142_v42, %v611_v10 }
   0xb   :  { %515 = vmatprep.mubr.msk.bf16.mxu0 %vm543_vm1, %v542_v0  ;;  %492 = vmatpush3.bf16.msra.mxu1 %v528_v16  ;;  %v445_v43 = vld.sshfl [vmem:[#allocation2] sm:$0x11 pattern:$0x75316420] }
   0xc   :  { %493 = vmatprep.subr.bf16.mxu1 %v542_v0  ;;  %508 = vmatpush3.bf16.msra.mxu0 %v534_v22  ;;  %v139_v44 = vcombine.high %v445_v43, %v445_v43  ;;  %v146_v46 = vrot.slane %v445_v43, %v145_v45 }
   0xd   :  { %509 = vmatprep.subr.bf16.mxu0 %v542_v0 }
   0xe   :  { %v153_v47 = vrot.slane %v139_v44, %v145_v45  ;;  %v159_v50 = vrot.slane %v146_v46, %v158_v48 }
   0xf   :  { %494 = vmatpush3.bf16.msra.mxu1 %v529_v17 }
  0x10   :  { %495 = vmatprep.subr.bf16.mxu1 %v542_v0  ;;  %510 = vmatpush3.bf16.msra.mxu0 %v535_v23  ;;  %v163_v51 = vrot.slane %v153_v47, %v158_v48 }
  0x11   :  { %511 = vmatprep.subr.bf16.mxu0 %v542_v0 }
  0x13   :  { %496 = vmatpush3.bf16.msra.mxu1 %v530_v18 }
  0x14   :  { %497 = vmatprep.subr.bf16.mxu1 %v542_v0  ;;  %512 = vmatpush3.bf16.msra.mxu0 %v536_v24 }
  0x15   :  { %513 = vmatprep.subr.bf16.mxu0 %v542_v0 }
  0x17   :  { %498 = vmatpush3.bf16.msra.mxu1 %v531_v19 }
  0x18   :  { %499 = vmatprep.subr.bf16.mxu1 %v542_v0  ;;  %514 = vmatpush3.bf16.msra.mxu0 %v537_v26 }
  0x1b   :  { %500 = vmatpush3.bf16.msra.mxu1 %v532_v20 }
  0x1c   :  { %501 = vmatprep.subr.bf16.mxu1 %v542_v0 }
  0x1f   :  { %502 = vmatpush3.bf16.msra.mxu1 %v533_v21 }
  0xca   :  { %v105_v27 = vpop.f32.mrf.mxu0 }
  0xcb   :  { %v106_v28 = vadd.f32 %v441_v25, %v105_v27 }
  0xcc   :  { %v485_v29 = vpop.f32.mrf.mxu0 }
  0xcd   :  { %v111_v30 = vmul.f32 0.2, %v106_v28  ;;  %v414_v29 = vld [vmem:[%s707_s8] sm:$0x3] }
  0xce   :  { %v108_v31 = vpop.f32.mrf.mxu0 }
  0xcf   :  { %v112_v32 = vmax.f32 %v106_v28, %v111_v30 }
  0xd0   :  { %v486_v34 = vpop.f32.mrf.mxu0 }
  0xd1   :  { %114 = vrot.lane.b32.xlu0 %v112_v32, %s545_s14  ;;  %v184_v35 = vpack.c.bf16 %v112_v32, %v112_v32  ;;  %v168_v36 = vcombine.high %v112_v32, %v112_v32  ;;  %v172_v37 = vrot.slane %v112_v32, %v171_v33  ;;  %v460_v32 = vld [vmem:[#allocation3] ss:$0 sm:$0xff] }
  0xd3   :  { %504 = vmatmul.mubr.bf16.vlgmr.msra.gmra.mxu1 %v184_v35  ;;  %v176_v38 = vrot.slane %v168_v36, %v171_v33 }
  0xd5   :  { %v178_v39 = vsel %vm177_vm4, %v176_v38, %v172_v37 }
  0xd6   :  { %179 = vrot.lane.b32.xlu1 %v178_v39, %s545_s14 }
 0x143   :  { %v115_v49 = vpop.permute.xlu0 %114 }
 0x144   :  { %v117_v52 = vrot.slane %v115_v49, 7 }
 0x146   :  { %v128_v53 = vcombine.high %v117_v52, %v117_v52  ;;  %v166_v54 = vsel %vm126_vm5, %v159_v50, %v117_v52 }
 0x148   :  { %v167_v55 = vsel %vm126_vm5, %v163_v51, %v128_v53  ;;  %v180_v56 = vpop.permute.xlu1 %179 }
 0x149   :  { %v187_v57 = vcombine.low %v166_v54, %v167_v55  ;;  %183 = vst.msk [vmem:[#allocation2 - $0x3] sm:$0x18] %vm182_vm6, %v180_v56 }
 0x14b   :  { %v189_v58 = vpack.c.bf16 %v187_v57, %v187_v57 }
 0x14d   :  { %516 = vmatmul.mubr.msk.bf16.vlgmr.msra.gmra.mxu0 %vm326_vm7, %v189_v58 }
 0x193   :  { %v296_v59 = vpop.f32.mrf.mxu1 }
 0x195   :  { %v505_v60 = vpop.f32.mrf.mxu1 }
 0x197   :  { %v299_v61 = vpop.f32.mrf.mxu1 }
 0x199   :  { %v506_v62 = vpop.f32.mrf.mxu1 }
 0x20d   :  { %v364_v1 = vpop.f32.mrf.mxu0 }
 0x20e   :  { %v365_v3 = vadd.f32 %v364_v1, %v296_v59 }
 0x20f   :  { %v517_v4 = vpop.f32.mrf.mxu0 }
 0x210   :  { %v377_v5 = vadd.f32 %v459_v2, %v365_v3 }
 0x211   :  { %v367_v6 = vpop.f32.mrf.mxu0 }
 0x212   :  { %v378_v7 = vmul.f32 0.2, %v377_v5 }
 0x213   :  { %v518_v9 = vpop.f32.mrf.mxu0 }
 0x214   :  { %v379_v10 = vmax.f32 %v377_v5, %v378_v7 }
 0x216   :  { %v381_v11 = vcombine.high %v379_v10, %v379_v10  ;;  %v384_v0 = vmul.f32 %v383_v8, %v379_v10 }
 0x218   :  { %v385_v12 = vmul.f32 %v383_v8, %v381_v11  ;;  %v387_v13 = vsel %vm386_vm9, %v384_v0, 0.0 }
 0x219   :  { %v388_v14 = vrot.slane %v387_v13, 4 }
 0x21a   :  { %v394_v15 = vsel %vm386_vm9, %v385_v12, 0.0 }
 0x21b   :  { %v389_v16 = vadd.f32 %v388_v14, %v387_v13  ;;  %v395_v17 = vrot.slane %v394_v15, 4 }
 0x21d   :  { %v390_v18 = vrot.slane %v389_v16, 2  ;;  %v396_v19 = vadd.f32 %v395_v17, %v394_v15 }
 0x21f   :  { %v391_v20 = vadd.f32 %v390_v18, %v389_v16  ;;  %v397_v21 = vrot.slane %v396_v19, 2 }
 0x221   :  { %v392_v22 = vrot.slane %v391_v20, 1  ;;  %v398_v23 = vadd.f32 %v397_v21, %v396_v19 }
 0x223   :  { %v399_v24 = vrot.slane %v398_v23, 1  ;;  %v393_v25 = vadd.f32 %v392_v22, %v391_v20 }
 0x225   :  { %v400_v26 = vadd.f32 %v399_v24, %v398_v23 }
 0x227   :  { %v404_v27 = vsel %vm403_vm10, %v400_v26, %v393_v25 }
 0x228   :  { %v406_v28 = vsel %vm67_vm0, %v404_v27, 0.0 }
 0x229   :  { %407 = vadd.xlane.f32.xlu0 %v406_v28 }
 0x2b2   :  { %v408_v30 = vpop.xlane.xlu0 %407 }
 0x2b3   :  { %v415_v31 = vadd.f32 %v414_v29, %v408_v30 }
 0x2b5   :  { %417 = vst.msk [vmem:[%s707_s8] sm:$0x3] %vm412_vm8, %v415_v31 }
 0x2bc   :  { %v421_v33 = vld [vmem:[%s707_s8] sm:$0x3] }
 0x2bd   :  { %v429_v34 = vadd.f32 %v460_v32, %v421_v33 }
 0x2bf   :  { %v461_v35 = vmul.f32 -1.442695, %v429_v34 }
 0x2c1   :  { %538 = vpow2.f32 %v461_v35 }
 0x2ce   :  { %v539_v36 = vpop.eup %538 }
 0x2cf   :  { %v433_v37 = vadd.f32 1.0, %v539_v36 }
 0x2d1   :  { %540 = vrcp.f32 %v433_v37 }
 0x2de   :  { %v541_v38 = vpop.eup %540 }
 0x2df   :  { %436 = vst.msk [vmem:[%s707_s8] sm:$0x3] %vm412_vm8, %v541_v38 }

</bundles_post_ra>
